<compile_context>
chip_gen: v7x
topology: tpu7x:2x2x1
jax: 0.10.0
libtpu: 0.0.40
codegen_flags: <defaults>
</compile_context>

<pallas_src>
import functools

import jax
import jax.numpy as jnp
from jax.experimental import pallas as pl
from jax.experimental.pallas import tpu as pltpu


def _cross_attn_kernel(audio_ref, wq_ref, wk_ref, wv_ref, out_ref,
                       k_scr, v_scr, *, h, tq):
    # audio_ref: (1, N, C)        wq/wk/wv_ref: (h, C, d)  (wq pre-scaled)
    # out_ref:   (1, h, tq, d)    k_scr/v_scr: (h, N, d) persistent VMEM scratch
    qi = pl.program_id(1)
    compute_dtype = k_scr.dtype
    f32 = jnp.float32

    # ---- once per batch element: per-head K/V projection into scratch -------
    # Valid only because the q-tile axis is the innermost, sequentially
    # iterated ("arbitrary") grid axis within each batch element.
    @pl.when(qi == 0)
    def _project_kv():
        x = audio_ref[0]                                            # (N, C)
        for hd in range(h):                                         # static unroll
            k_scr[hd] = jnp.dot(x, wk_ref[hd],
                                preferred_element_type=f32).astype(compute_dtype)
            v_scr[hd] = jnp.dot(x, wv_ref[hd],
                                preferred_element_type=f32).astype(compute_dtype)

    # ---- per query tile: Q projection + per-head attention ------------------
    start = pl.multiple_of(qi * tq, tq)
    x_tile = audio_ref[0, pl.ds(start, tq), :]                      # (tq, C)

    softmax_bf16 = compute_dtype == jnp.bfloat16

    for hd in range(h):                                             # static unroll
        # Softmax scale already folded into wq on the host.
        q_h = jnp.dot(x_tile, wq_ref[hd],
                      preferred_element_type=f32).astype(compute_dtype)  # (tq, d)
        k_h = k_scr[hd]                                             # (N, d)
        v_h = v_scr[hd]                                             # (N, d)

        # Q K^T without materializing a transposed K (contract last dims).
        s = jnp.einsum('qd,kd->qk', q_h, k_h,
                       preferred_element_type=f32)                  # (tq, N) f32

        # Numerically stable softmax: max/denominator in f32.
        m = jnp.max(s, axis=-1, keepdims=True)
        if softmax_bf16:
            # bf16 exp/probabilities (v6e/v7x EUP/VPU bf16 path); denominator
            # still accumulates in f32.
            p = jnp.exp((s - m).astype(jnp.bfloat16))
            denom = jnp.sum(p, axis=-1, keepdims=True, dtype=f32)
            pv = p
        else:
            p = jnp.exp(s - m)                                      # f32
            denom = jnp.sum(p, axis=-1, keepdims=True)
            pv = p.astype(v_h.dtype)

        o = jnp.dot(pv, v_h, preferred_element_type=f32)            # (tq, d) f32
        o = o * pl.reciprocal(denom, approx=True)                   # EUP reciprocal

        # Lane-dense store: one whole head at lane offset 0.
        out_ref[0, hd] = o.astype(out_ref.dtype)


def _pick_query_tile(n, max_tile=128):
    # Cap at 128: f32 (tq, N) score temporaries + vreg pressure (esp. v5e).
    for cand in (128, 64, 32, 16, 8):
        if cand <= max_tile and n % cand == 0:
            return cand
    return n


def _vmem_limit_bytes(N, C, h, dim_head, tq, itemsize):
    """Lane-padding-aware scoped-VMEM estimate -> explicit vmem_limit_bytes."""
    pad = lambda x, m: ((x + m - 1) // m) * m
    d_p = pad(dim_head, 128)          # minor dim pads to 128 lanes (40 -> 128!)
    c_p = pad(C, 128)
    n_sub = pad(N, 8)
    tq_sub = pad(tq, 8)
    n_lane = pad(N, 128)
    scratch = 2 * h * n_sub * d_p * itemsize            # K/V caches (single copy)
    audio_buf = 2 * n_sub * c_p * itemsize               # double-buffered audio block
    weights = 2 * 3 * h * pad(C, 8) * d_p * itemsize     # double-buffered weights
    out_buf = 2 * h * tq_sub * d_p * itemsize            # double-buffered output block
    temps = 6 * tq_sub * n_lane * 4                      # f32 score/prob temporaries
    est = scratch + audio_buf + weights + out_buf + temps
    # Raise above conservative defaults (16 MiB v5e / 32 MiB v6e,v7x) but stay
    # safely under v7x's 64 MiB physical VMEM.
    return int(min(max(2 * est, 32 * 1024 * 1024), 56 * 1024 * 1024))


def my_cross_attention(audio, wq, wk, wv, *, h, dim_head, tq=None):
    """audio: (B, N, C); wq/wk/wv: (C, h*dim_head). Returns (B, N, h*dim_head)."""
    B, N, C = audio.shape
    inner = h * dim_head
    assert wq.shape == (C, inner) and wk.shape == (C, inner) and wv.shape == (C, inner)
    scale = float(dim_head) ** (-0.5)

    # Fold the softmax scale into the Q weight (zero in-kernel cost) and
    # pre-split every weight per head: (C, h*d) -> (h, C, d). This lets the
    # kernel write each head's projection straight into its scratch slot with
    # no wide f32 temporary and no lane-unaligned slicing.
    def split_heads_w(w):
        return w.reshape(C, h, dim_head).transpose(1, 0, 2)         # (h, C, d)

    wq_h = split_heads_w(wq * jnp.asarray(scale, dtype=wq.dtype))
    wk_h = split_heads_w(wk)
    wv_h = split_heads_w(wv)

    if tq is None:
        tq = _pick_query_tile(N)
    assert N % tq == 0 and (tq % 8 == 0 or tq == N), \
        "query tile must divide N and be 8-aligned"
    nq = N // tq

    kernel = functools.partial(_cross_attn_kernel, h=h, tq=tq)
    vmem_limit = _vmem_limit_bytes(N, C, h, dim_head, tq, audio.dtype.itemsize)

    out_heads = pl.pallas_call(
        kernel,
        # (B, h, N, d): every in-kernel store is a lane-dense whole-head write.
        out_shape=jax.ShapeDtypeStruct((B, h, N, dim_head), audio.dtype),
        grid_spec=pltpu.PrefetchScalarGridSpec(
            num_scalar_prefetch=0,
            grid=(B, nq),
            in_specs=[
                # Full-sequence audio block; block index is constant across the
                # q-tile axis, so it is DMA'd once per batch element.
                pl.BlockSpec((1, N, C), lambda b, q: (b, 0, 0)),
                # Per-head weights, constant across the whole grid.
                pl.BlockSpec((h, C, dim_head), lambda b, q: (0, 0, 0)),
                pl.BlockSpec((h, C, dim_head), lambda b, q: (0, 0, 0)),
                pl.BlockSpec((h, C, dim_head), lambda b, q: (0, 0, 0)),
            ],
            out_specs=pl.BlockSpec((1, h, tq, dim_head), lambda b, q: (b, 0, q, 0)),
            scratch_shapes=[
                pltpu.VMEM((h, N, dim_head), audio.dtype),   # K cache
                pltpu.VMEM((h, N, dim_head), audio.dtype),   # V cache
            ],
        ),
        compiler_params=pltpu.CompilerParams(
            # Batch elements are independent (megacore sharding). The q-tile
            # axis reads the per-batch K/V cache written at qi==0, so it MUST
            # stay innermost and "arbitrary".
            dimension_semantics=("parallel", "arbitrary"),
            vmem_limit_bytes=vmem_limit),
    )(audio, wq_h, wk_h, wv_h)

    # 'b h n d -> b n (h d)' — cheap XLA layout plumbing outside the kernel.
    return out_heads.transpose(0, 2, 1, 3).reshape(B, N, inner)


def _reference(audio, wq, wk, wv, *, h, dim_head):
    """Pure-JAX reference mirroring the PyTorch forward."""
    B, N, C = audio.shape
    scale = float(dim_head) ** (-0.5)
    q = audio @ wq
    k = audio @ wk
    v = audio @ wv

    def split_heads(t):  # 'b n (h d) -> (b h) n d'
        return t.reshape(B, N, h, dim_head).transpose(0, 2, 1, 3).reshape(B * h, N, dim_head)

    q, k, v = map(split_heads, (q, k, v))
    sim = jnp.einsum('bid,bjd->bij', q, k) * scale
    attn = jax.nn.softmax(sim, axis=-1)
    out = jnp.einsum('bij,bjd->bid', attn, v)
    # '(b h) n d -> b n (h d)'
    out = out.reshape(B, h, N, dim_head).transpose(0, 2, 1, 3).reshape(B, N, h * dim_head)
    return out


if __name__ == "__main__":
    # Small shapes consistent with the module (scaled down from
    # context_dim=768, h=8, dim_head=40).
    B, N = 2, 16
    context_dim = 32
    h, dim_head = 4, 8
    inner = h * dim_head

    key = jax.random.PRNGKey(0)
    k_a, k_q, k_k, k_v = jax.random.split(key, 4)

    audio = jax.random.normal(k_a, (B, N, context_dim), dtype=jnp.float32)
    init_scale = 1.0 / (context_dim ** 0.5)
    wq = jax.random.normal(k_q, (context_dim, inner), dtype=jnp.float32) * init_scale
    wk = jax.random.normal(k_k, (context_dim, inner), dtype=jnp.float32) * init_scale
    wv = jax.random.normal(k_v, (context_dim, inner), dtype=jnp.float32) * init_scale

    # tq=8 forces a multi-tile query grid (grid = (B, 2)) so the pl.when(qi==0)
    # K/V-cache path is exercised even at these small shapes.
    out = my_cross_attention(audio, wq, wk, wv, h=h, dim_head=dim_head, tq=8)
    out = jax.block_until_ready(out)

    ref = _reference(audio, wq, wk, wv, h=h, dim_head=dim_head)
    assert out.shape == (B, N, inner)
    # approx=True EUP reciprocal slightly loosens tolerance vs an exact divide.
    assert jnp.allclose(out, ref, atol=1e-2, rtol=1e-2), "mismatch vs reference"

    print("KERNEL_OK")
</pallas_src>

<mosaic_0001>
module attributes {stable_mosaic.version = 11 : i64} {
  func.func @_cross_attn_kernel(%arg0: i32, %arg1: i32, %arg2: memref<1x16x32xf32, #tpu.memory_space<vmem>>, %arg3: memref<4x32x8xf32, #tpu.memory_space<vmem>>, %arg4: memref<4x32x8xf32, #tpu.memory_space<vmem>>, %arg5: memref<4x32x8xf32, #tpu.memory_space<vmem>>, %arg6: memref<1x4x8x8xf32, #tpu.memory_space<vmem>>, %arg7: memref<4x16x8xf32, #tpu.memory_space<vmem>>, %arg8: memref<4x16x8xf32, #tpu.memory_space<vmem>>) attributes {dimension_semantics = [#tpu.dimension_semantics<parallel>, #tpu.dimension_semantics<arbitrary>], iteration_bounds = array<i64: 2, 2>, scalar_prefetch = 0 : i64, scratch_operands = 2 : i64, tpu.core_type = #tpu.core_type<tc>, window_params = [{transform_indices = @transform_0, window_bounds = array<i64: 1, 16, 32>}, {pipeline_mode = #tpu.pipeline_mode<synchronous>, transform_indices = @transform_1, window_bounds = array<i64: 4, 32, 8>}, {pipeline_mode = #tpu.pipeline_mode<synchronous>, transform_indices = @transform_2, window_bounds = array<i64: 4, 32, 8>}, {pipeline_mode = #tpu.pipeline_mode<synchronous>, transform_indices = @transform_3, window_bounds = array<i64: 4, 32, 8>}, {transform_indices = @transform_4, window_bounds = array<i64: 1, 4, 8, 8>}]} {
    %c0_i32 = arith.constant 0 : i32
    %0 = arith.cmpi eq, %arg1, %c0_i32 : i32
    %1 = arith.extui %0 : i1 to i32
    %c0_i32_0 = arith.constant 0 : i32
    %2 = arith.cmpi ne, %1, %c0_i32_0 : i32
    scf.if %2 {
      %c0_70 = arith.constant 0 : index
      %c0_71 = arith.constant 0 : index
      %c0_72 = arith.constant 0 : index
      %96 = vector.load %arg2[%c0_70, %c0_71, %c0_72] : memref<1x16x32xf32, #tpu.memory_space<vmem>>, vector<1x16x32xf32>
      %97 = vector.shape_cast %96 : vector<1x16x32xf32> to vector<16x32xf32>
      %c0_73 = arith.constant 0 : index
      %c0_74 = arith.constant 0 : index
      %c0_75 = arith.constant 0 : index
      %98 = vector.load %arg4[%c0_73, %c0_74, %c0_75] : memref<4x32x8xf32, #tpu.memory_space<vmem>>, vector<1x32x8xf32>
      %99 = vector.shape_cast %98 : vector<1x32x8xf32> to vector<32x8xf32>
      %cst_76 = arith.constant dense<0.000000e+00> : vector<16x8xf32>
      %100 = tpu.matmul %97, %99, %cst_76 {dimension_numbers = #tpu.dot_dimension_numbers<[1], [0], [0], [1], [0, 0, 1, 1], [], []>} : vector<16x32xf32>, vector<32x8xf32>, vector<16x8xf32> -> vector<16x8xf32>
      %c0_77 = arith.constant 0 : index
      %c0_78 = arith.constant 0 : index
      %c0_79 = arith.constant 0 : index
      %101 = vector.load %arg7[%c0_77, %c0_78, %c0_79] : memref<4x16x8xf32, #tpu.memory_space<vmem>>, vector<1x16x8xf32>
      %102 = vector.shape_cast %101 : vector<1x16x8xf32> to vector<16x8xf32>
      %103 = vector.shape_cast %100 : vector<16x8xf32> to vector<1x16x8xf32>
      tpu.vector_store %arg7[%c0_77, %c0_78, %c0_79], %103 {strides = array<i32>} : memref<4x16x8xf32, #tpu.memory_space<vmem>>, vector<1x16x8xf32>,
      %c0_80 = arith.constant 0 : index
      %c0_81 = arith.constant 0 : index
      %c0_82 = arith.constant 0 : index
      %104 = vector.load %arg5[%c0_80, %c0_81, %c0_82] : memref<4x32x8xf32, #tpu.memory_space<vmem>>, vector<1x32x8xf32>
      %105 = vector.shape_cast %104 : vector<1x32x8xf32> to vector<32x8xf32>
      %cst_83 = arith.constant dense<0.000000e+00> : vector<16x8xf32>
      %106 = tpu.matmul %97, %105, %cst_83 {dimension_numbers = #tpu.dot_dimension_numbers<[1], [0], [0], [1], [0, 0, 1, 1], [], []>} : vector<16x32xf32>, vector<32x8xf32>, vector<16x8xf32> -> vector<16x8xf32>
      %c0_84 = arith.constant 0 : index
      %c0_85 = arith.constant 0 : index
      %c0_86 = arith.constant 0 : index
      %107 = vector.load %arg8[%c0_84, %c0_85, %c0_86] : memref<4x16x8xf32, #tpu.memory_space<vmem>>, vector<1x16x8xf32>
      %108 = vector.shape_cast %107 : vector<1x16x8xf32> to vector<16x8xf32>
      %109 = vector.shape_cast %106 : vector<16x8xf32> to vector<1x16x8xf32>
      tpu.vector_store %arg8[%c0_84, %c0_85, %c0_86], %109 {strides = array<i32>} : memref<4x16x8xf32, #tpu.memory_space<vmem>>, vector<1x16x8xf32>,
      %c1_87 = arith.constant 1 : index
      %c0_88 = arith.constant 0 : index
      %c0_89 = arith.constant 0 : index
      %110 = vector.load %arg4[%c1_87, %c0_88, %c0_89] : memref<4x32x8xf32, #tpu.memory_space<vmem>>, vector<1x32x8xf32>
      %111 = vector.shape_cast %110 : vector<1x32x8xf32> to vector<32x8xf32>
      %cst_90 = arith.constant dense<0.000000e+00> : vector<16x8xf32>
      %112 = tpu.matmul %97, %111, %cst_90 {dimension_numbers = #tpu.dot_dimension_numbers<[1], [0], [0], [1], [0, 0, 1, 1], [], []>} : vector<16x32xf32>, vector<32x8xf32>, vector<16x8xf32> -> vector<16x8xf32>
      %c1_91 = arith.constant 1 : index
      %c0_92 = arith.constant 0 : index
      %c0_93 = arith.constant 0 : index
      %113 = vector.load %arg7[%c1_91, %c0_92, %c0_93] : memref<4x16x8xf32, #tpu.memory_space<vmem>>, vector<1x16x8xf32>
      %114 = vector.shape_cast %113 : vector<1x16x8xf32> to vector<16x8xf32>
      %115 = vector.shape_cast %112 : vector<16x8xf32> to vector<1x16x8xf32>
      tpu.vector_store %arg7[%c1_91, %c0_92, %c0_93], %115 {strides = array<i32>} : memref<4x16x8xf32, #tpu.memory_space<vmem>>, vector<1x16x8xf32>,
      %c1_94 = arith.constant 1 : index
      %c0_95 = arith.constant 0 : index
      %c0_96 = arith.constant 0 : index
      %116 = vector.load %arg5[%c1_94, %c0_95, %c0_96] : memref<4x32x8xf32, #tpu.memory_space<vmem>>, vector<1x32x8xf32>
      %117 = vector.shape_cast %116 : vector<1x32x8xf32> to vector<32x8xf32>
      %cst_97 = arith.constant dense<0.000000e+00> : vector<16x8xf32>
      %118 = tpu.matmul %97, %117, %cst_97 {dimension_numbers = #tpu.dot_dimension_numbers<[1], [0], [0], [1], [0, 0, 1, 1], [], []>} : vector<16x32xf32>, vector<32x8xf32>, vector<16x8xf32> -> vector<16x8xf32>
      %c1_98 = arith.constant 1 : index
      %c0_99 = arith.constant 0 : index
      %c0_100 = arith.constant 0 : index
      %119 = vector.load %arg8[%c1_98, %c0_99, %c0_100] : memref<4x16x8xf32, #tpu.memory_space<vmem>>, vector<1x16x8xf32>
      %120 = vector.shape_cast %119 : vector<1x16x8xf32> to vector<16x8xf32>
      %121 = vector.shape_cast %118 : vector<16x8xf32> to vector<1x16x8xf32>
      tpu.vector_store %arg8[%c1_98, %c0_99, %c0_100], %121 {strides = array<i32>} : memref<4x16x8xf32, #tpu.memory_space<vmem>>, vector<1x16x8xf32>,
      %c2_101 = arith.constant 2 : index
      %c0_102 = arith.constant 0 : index
      %c0_103 = arith.constant 0 : index
      %122 = vector.load %arg4[%c2_101, %c0_102, %c0_103] : memref<4x32x8xf32, #tpu.memory_space<vmem>>, vector<1x32x8xf32>
      %123 = vector.shape_cast %122 : vector<1x32x8xf32> to vector<32x8xf32>
      %cst_104 = arith.constant dense<0.000000e+00> : vector<16x8xf32>
      %124 = tpu.matmul %97, %123, %cst_104 {dimension_numbers = #tpu.dot_dimension_numbers<[1], [0], [0], [1], [0, 0, 1, 1], [], []>} : vector<16x32xf32>, vector<32x8xf32>, vector<16x8xf32> -> vector<16x8xf32>
      %c2_105 = arith.constant 2 : index
      %c0_106 = arith.constant 0 : index
      %c0_107 = arith.constant 0 : index
      %125 = vector.load %arg7[%c2_105, %c0_106, %c0_107] : memref<4x16x8xf32, #tpu.memory_space<vmem>>, vector<1x16x8xf32>
      %126 = vector.shape_cast %125 : vector<1x16x8xf32> to vector<16x8xf32>
      %127 = vector.shape_cast %124 : vector<16x8xf32> to vector<1x16x8xf32>
      tpu.vector_store %arg7[%c2_105, %c0_106, %c0_107], %127 {strides = array<i32>} : memref<4x16x8xf32, #tpu.memory_space<vmem>>, vector<1x16x8xf32>,
      %c2_108 = arith.constant 2 : index
      %c0_109 = arith.constant 0 : index
      %c0_110 = arith.constant 0 : index
      %128 = vector.load %arg5[%c2_108, %c0_109, %c0_110] : memref<4x32x8xf32, #tpu.memory_space<vmem>>, vector<1x32x8xf32>
      %129 = vector.shape_cast %128 : vector<1x32x8xf32> to vector<32x8xf32>
      %cst_111 = arith.constant dense<0.000000e+00> : vector<16x8xf32>
      %130 = tpu.matmul %97, %129, %cst_111 {dimension_numbers = #tpu.dot_dimension_numbers<[1], [0], [0], [1], [0, 0, 1, 1], [], []>} : vector<16x32xf32>, vector<32x8xf32>, vector<16x8xf32> -> vector<16x8xf32>
      %c2_112 = arith.constant 2 : index
      %c0_113 = arith.constant 0 : index
      %c0_114 = arith.constant 0 : index
      %131 = vector.load %arg8[%c2_112, %c0_113, %c0_114] : memref<4x16x8xf32, #tpu.memory_space<vmem>>, vector<1x16x8xf32>
      %132 = vector.shape_cast %131 : vector<1x16x8xf32> to vector<16x8xf32>
      %133 = vector.shape_cast %130 : vector<16x8xf32> to vector<1x16x8xf32>
      tpu.vector_store %arg8[%c2_112, %c0_113, %c0_114], %133 {strides = array<i32>} : memref<4x16x8xf32, #tpu.memory_space<vmem>>, vector<1x16x8xf32>,
      %c3_115 = arith.constant 3 : index
      %c0_116 = arith.constant 0 : index
      %c0_117 = arith.constant 0 : index
      %134 = vector.load %arg4[%c3_115, %c0_116, %c0_117] : memref<4x32x8xf32, #tpu.memory_space<vmem>>, vector<1x32x8xf32>
      %135 = vector.shape_cast %134 : vector<1x32x8xf32> to vector<32x8xf32>
      %cst_118 = arith.constant dense<0.000000e+00> : vector<16x8xf32>
      %136 = tpu.matmul %97, %135, %cst_118 {dimension_numbers = #tpu.dot_dimension_numbers<[1], [0], [0], [1], [0, 0, 1, 1], [], []>} : vector<16x32xf32>, vector<32x8xf32>, vector<16x8xf32> -> vector<16x8xf32>
      %c3_119 = arith.constant 3 : index
      %c0_120 = arith.constant 0 : index
      %c0_121 = arith.constant 0 : index
      %137 = vector.load %arg7[%c3_119, %c0_120, %c0_121] : memref<4x16x8xf32, #tpu.memory_space<vmem>>, vector<1x16x8xf32>
      %138 = vector.shape_cast %137 : vector<1x16x8xf32> to vector<16x8xf32>
      %139 = vector.shape_cast %136 : vector<16x8xf32> to vector<1x16x8xf32>
      tpu.vector_store %arg7[%c3_119, %c0_120, %c0_121], %139 {strides = array<i32>} : memref<4x16x8xf32, #tpu.memory_space<vmem>>, vector<1x16x8xf32>,
      %c3_122 = arith.constant 3 : index
      %c0_123 = arith.constant 0 : index
      %c0_124 = arith.constant 0 : index
      %140 = vector.load %arg5[%c3_122, %c0_123, %c0_124] : memref<4x32x8xf32, #tpu.memory_space<vmem>>, vector<1x32x8xf32>
      %141 = vector.shape_cast %140 : vector<1x32x8xf32> to vector<32x8xf32>
      %cst_125 = arith.constant dense<0.000000e+00> : vector<16x8xf32>
      %142 = tpu.matmul %97, %141, %cst_125 {dimension_numbers = #tpu.dot_dimension_numbers<[1], [0], [0], [1], [0, 0, 1, 1], [], []>} : vector<16x32xf32>, vector<32x8xf32>, vector<16x8xf32> -> vector<16x8xf32>
      %c3_126 = arith.constant 3 : index
      %c0_127 = arith.constant 0 : index
      %c0_128 = arith.constant 0 : index
      %143 = vector.load %arg8[%c3_126, %c0_127, %c0_128] : memref<4x16x8xf32, #tpu.memory_space<vmem>>, vector<1x16x8xf32>
      %144 = vector.shape_cast %143 : vector<1x16x8xf32> to vector<16x8xf32>
      %145 = vector.shape_cast %142 : vector<16x8xf32> to vector<1x16x8xf32>
      tpu.vector_store %arg8[%c3_126, %c0_127, %c0_128], %145 {strides = array<i32>} : memref<4x16x8xf32, #tpu.memory_space<vmem>>, vector<1x16x8xf32>,
    } else {
    }
    %c8_i32 = arith.constant 8 : i32
    %3 = arith.muli %arg1, %c8_i32 : i32
    %4 = tpu.assume_multiple %3, 8 : i32
    %c0 = arith.constant 0 : index
    %5 = arith.index_cast %4 : i32 to index
    %c0_1 = arith.constant 0 : index
    %6 = vector.load %arg2[%c0, %5, %c0_1] : memref<1x16x32xf32, #tpu.memory_space<vmem>>, vector<1x8x32xf32>
    %7 = vector.shape_cast %6 : vector<1x8x32xf32> to vector<8x32xf32>
    %c0_2 = arith.constant 0 : index
    %c0_3 = arith.constant 0 : index
    %c0_4 = arith.constant 0 : index
    %8 = vector.load %arg3[%c0_2, %c0_3, %c0_4] : memref<4x32x8xf32, #tpu.memory_space<vmem>>, vector<1x32x8xf32>
    %9 = vector.shape_cast %8 : vector<1x32x8xf32> to vector<32x8xf32>
    %cst = arith.constant dense<0.000000e+00> : vector<8x8xf32>
    %10 = tpu.matmul %7, %9, %cst {dimension_numbers = #tpu.dot_dimension_numbers<[1], [0], [0], [1], [0, 0, 1, 1], [], []>} : vector<8x32xf32>, vector<32x8xf32>, vector<8x8xf32> -> vector<8x8xf32>
    %c0_5 = arith.constant 0 : index
    %c0_6 = arith.constant 0 : index
    %c0_7 = arith.constant 0 : index
    %11 = vector.load %arg7[%c0_5, %c0_6, %c0_7] : memref<4x16x8xf32, #tpu.memory_space<vmem>>, vector<1x16x8xf32>
    %12 = vector.shape_cast %11 : vector<1x16x8xf32> to vector<16x8xf32>
    %c0_8 = arith.constant 0 : index
    %c0_9 = arith.constant 0 : index
    %c0_10 = arith.constant 0 : index
    %13 = vector.load %arg8[%c0_8, %c0_9, %c0_10] : memref<4x16x8xf32, #tpu.memory_space<vmem>>, vector<1x16x8xf32>
    %14 = vector.shape_cast %13 : vector<1x16x8xf32> to vector<16x8xf32>
    "tpu.trace_start"() <{level = 10 : i32, message = "qd,kd->qk"}> : () -> ()
    %cst_11 = arith.constant dense<0.000000e+00> : vector<8x16xf32>
    %15 = tpu.matmul %10, %12, %cst_11 {dimension_numbers = #tpu.dot_dimension_numbers<[1], [1], [0], [0], [0, 0, 1, 0], [], []>} : vector<8x8xf32>, vector<16x8xf32>, vector<8x16xf32> -> vector<8x16xf32>
    "tpu.trace_stop"() : () -> ()
    %cst_12 = arith.constant dense<0xFF800000> : vector<8xf32>
    %16 = vector.multi_reduction <maximumf>, %15, %cst_12 [1] : vector<8x16xf32> to vector<8xf32>
    %17 = vector.shape_cast %16 : vector<8xf32> to vector<8x1xf32>
    %18 = vector.broadcast %17 : vector<8x1xf32> to vector<8x16xf32>
    %19 = arith.subf %15, %18 : vector<8x16xf32>
    %20 = math.exp %19 : vector<8x16xf32>
    %cst_13 = arith.constant dense<0.000000e+00> : vector<8xf32>
    %21 = vector.multi_reduction <add>, %20, %cst_13 [1] : vector<8x16xf32> to vector<8xf32>
    %22 = vector.shape_cast %21 : vector<8xf32> to vector<8x1xf32>
    %cst_14 = arith.constant dense<0.000000e+00> : vector<8x8xf32>
    %23 = tpu.matmul %20, %14, %cst_14 {dimension_numbers = #tpu.dot_dimension_numbers<[1], [0], [0], [1], [0, 0, 1, 1], [], []>} : vector<8x16xf32>, vector<16x8xf32>, vector<8x8xf32> -> vector<8x8xf32>
    %24 = tpu.reciprocal %22 {approx = true} : vector<8x1xf32> -> vector<8x1xf32>
    %25 = vector.broadcast %24 : vector<8x1xf32> to vector<8x8xf32>
    %26 = arith.mulf %23, %25 : vector<8x8xf32>
    %c0_15 = arith.constant 0 : index
    %c0_16 = arith.constant 0 : index
    %c0_17 = arith.constant 0 : index
    %c0_18 = arith.constant 0 : index
    %27 = vector.load %arg6[%c0_15, %c0_16, %c0_17, %c0_18] : memref<1x4x8x8xf32, #tpu.memory_space<vmem>>, vector<1x1x8x8xf32>
    %28 = vector.shape_cast %27 : vector<1x1x8x8xf32> to vector<8x8xf32>
    %29 = vector.shape_cast %26 : vector<8x8xf32> to vector<1x1x8x8xf32>
    tpu.vector_store %arg6[%c0_15, %c0_16, %c0_17, %c0_18], %29 {strides = array<i32>} : memref<1x4x8x8xf32, #tpu.memory_space<vmem>>, vector<1x1x8x8xf32>,
    %c1 = arith.constant 1 : index
    %c0_19 = arith.constant 0 : index
    %c0_20 = arith.constant 0 : index
    %30 = vector.load %arg3[%c1, %c0_19, %c0_20] : memref<4x32x8xf32, #tpu.memory_space<vmem>>, vector<1x32x8xf32>
    %31 = vector.shape_cast %30 : vector<1x32x8xf32> to vector<32x8xf32>
    %cst_21 = arith.constant dense<0.000000e+00> : vector<8x8xf32>
    %32 = tpu.matmul %7, %31, %cst_21 {dimension_numbers = #tpu.dot_dimension_numbers<[1], [0], [0], [1], [0, 0, 1, 1], [], []>} : vector<8x32xf32>, vector<32x8xf32>, vector<8x8xf32> -> vector<8x8xf32>
    %c1_22 = arith.constant 1 : index
    %c0_23 = arith.constant 0 : index
    %c0_24 = arith.constant 0 : index
    %33 = vector.load %arg7[%c1_22, %c0_23, %c0_24] : memref<4x16x8xf32, #tpu.memory_space<vmem>>, vector<1x16x8xf32>
    %34 = vector.shape_cast %33 : vector<1x16x8xf32> to vector<16x8xf32>
    %c1_25 = arith.constant 1 : index
    %c0_26 = arith.constant 0 : index
    %c0_27 = arith.constant 0 : index
    %35 = vector.load %arg8[%c1_25, %c0_26, %c0_27] : memref<4x16x8xf32, #tpu.memory_space<vmem>>, vector<1x16x8xf32>
    %36 = vector.shape_cast %35 : vector<1x16x8xf32> to vector<16x8xf32>
    "tpu.trace_start"() <{level = 10 : i32, message = "qd,kd->qk"}> : () -> ()
    %cst_28 = arith.constant dense<0.000000e+00> : vector<8x16xf32>
    %37 = tpu.matmul %32, %34, %cst_28 {dimension_numbers = #tpu.dot_dimension_numbers<[1], [1], [0], [0], [0, 0, 1, 0], [], []>} : vector<8x8xf32>, vector<16x8xf32>, vector<8x16xf32> -> vector<8x16xf32>
    "tpu.trace_stop"() : () -> ()
    %cst_29 = arith.constant dense<0xFF800000> : vector<8xf32>
    %38 = vector.multi_reduction <maximumf>, %37, %cst_29 [1] : vector<8x16xf32> to vector<8xf32>
    %39 = vector.shape_cast %38 : vector<8xf32> to vector<8x1xf32>
    %40 = vector.broadcast %39 : vector<8x1xf32> to vector<8x16xf32>
    %41 = arith.subf %37, %40 : vector<8x16xf32>
    %42 = math.exp %41 : vector<8x16xf32>
    %cst_30 = arith.constant dense<0.000000e+00> : vector<8xf32>
    %43 = vector.multi_reduction <add>, %42, %cst_30 [1] : vector<8x16xf32> to vector<8xf32>
    %44 = vector.shape_cast %43 : vector<8xf32> to vector<8x1xf32>
    %cst_31 = arith.constant dense<0.000000e+00> : vector<8x8xf32>
    %45 = tpu.matmul %42, %36, %cst_31 {dimension_numbers = #tpu.dot_dimension_numbers<[1], [0], [0], [1], [0, 0, 1, 1], [], []>} : vector<8x16xf32>, vector<16x8xf32>, vector<8x8xf32> -> vector<8x8xf32>
    %46 = tpu.reciprocal %44 {approx = true} : vector<8x1xf32> -> vector<8x1xf32>
    %47 = vector.broadcast %46 : vector<8x1xf32> to vector<8x8xf32>
    %48 = arith.mulf %45, %47 : vector<8x8xf32>
    %c0_32 = arith.constant 0 : index
    %c1_33 = arith.constant 1 : index
    %c0_34 = arith.constant 0 : index
    %c0_35 = arith.constant 0 : index
    %49 = vector.load %arg6[%c0_32, %c1_33, %c0_34, %c0_35] : memref<1x4x8x8xf32, #tpu.memory_space<vmem>>, vector<1x1x8x8xf32>
    %50 = vector.shape_cast %49 : vector<1x1x8x8xf32> to vector<8x8xf32>
    %51 = vector.shape_cast %48 : vector<8x8xf32> to vector<1x1x8x8xf32>
    tpu.vector_store %arg6[%c0_32, %c1_33, %c0_34, %c0_35], %51 {strides = array<i32>} : memref<1x4x8x8xf32, #tpu.memory_space<vmem>>, vector<1x1x8x8xf32>,
    %c2 = arith.constant 2 : index
    %c0_36 = arith.constant 0 : index
    %c0_37 = arith.constant 0 : index
    %52 = vector.load %arg3[%c2, %c0_36, %c0_37] : memref<4x32x8xf32, #tpu.memory_space<vmem>>, vector<1x32x8xf32>
    %53 = vector.shape_cast %52 : vector<1x32x8xf32> to vector<32x8xf32>
    %cst_38 = arith.constant dense<0.000000e+00> : vector<8x8xf32>
    %54 = tpu.matmul %7, %53, %cst_38 {dimension_numbers = #tpu.dot_dimension_numbers<[1], [0], [0], [1], [0, 0, 1, 1], [], []>} : vector<8x32xf32>, vector<32x8xf32>, vector<8x8xf32> -> vector<8x8xf32>
    %c2_39 = arith.constant 2 : index
    %c0_40 = arith.constant 0 : index
    %c0_41 = arith.constant 0 : index
    %55 = vector.load %arg7[%c2_39, %c0_40, %c0_41] : memref<4x16x8xf32, #tpu.memory_space<vmem>>, vector<1x16x8xf32>
    %56 = vector.shape_cast %55 : vector<1x16x8xf32> to vector<16x8xf32>
    %c2_42 = arith.constant 2 : index
    %c0_43 = arith.constant 0 : index
    %c0_44 = arith.constant 0 : index
    %57 = vector.load %arg8[%c2_42, %c0_43, %c0_44] : memref<4x16x8xf32, #tpu.memory_space<vmem>>, vector<1x16x8xf32>
    %58 = vector.shape_cast %57 : vector<1x16x8xf32> to vector<16x8xf32>
    "tpu.trace_start"() <{level = 10 : i32, message = "qd,kd->qk"}> : () -> ()
    %cst_45 = arith.constant dense<0.000000e+00> : vector<8x16xf32>
    %59 = tpu.matmul %54, %56, %cst_45 {dimension_numbers = #tpu.dot_dimension_numbers<[1], [1], [0], [0], [0, 0, 1, 0], [], []>} : vector<8x8xf32>, vector<16x8xf32>, vector<8x16xf32> -> vector<8x16xf32>
    "tpu.trace_stop"() : () -> ()
    %cst_46 = arith.constant dense<0xFF800000> : vector<8xf32>
    %60 = vector.multi_reduction <maximumf>, %59, %cst_46 [1] : vector<8x16xf32> to vector<8xf32>
    %61 = vector.shape_cast %60 : vector<8xf32> to vector<8x1xf32>
    %62 = vector.broadcast %61 : vector<8x1xf32> to vector<8x16xf32>
    %63 = arith.subf %59, %62 : vector<8x16xf32>
    %64 = math.exp %63 : vector<8x16xf32>
    %cst_47 = arith.constant dense<0.000000e+00> : vector<8xf32>
    %65 = vector.multi_reduction <add>, %64, %cst_47 [1] : vector<8x16xf32> to vector<8xf32>
    %66 = vector.shape_cast %65 : vector<8xf32> to vector<8x1xf32>
    %cst_48 = arith.constant dense<0.000000e+00> : vector<8x8xf32>
    %67 = tpu.matmul %64, %58, %cst_48 {dimension_numbers = #tpu.dot_dimension_numbers<[1], [0], [0], [1], [0, 0, 1, 1], [], []>} : vector<8x16xf32>, vector<16x8xf32>, vector<8x8xf32> -> vector<8x8xf32>
    %68 = tpu.reciprocal %66 {approx = true} : vector<8x1xf32> -> vector<8x1xf32>
    %69 = vector.broadcast %68 : vector<8x1xf32> to vector<8x8xf32>
    %70 = arith.mulf %67, %69 : vector<8x8xf32>
    %c0_49 = arith.constant 0 : index
    %c2_50 = arith.constant 2 : index
    %c0_51 = arith.constant 0 : index
    %c0_52 = arith.constant 0 : index
    %71 = vector.load %arg6[%c0_49, %c2_50, %c0_51, %c0_52] : memref<1x4x8x8xf32, #tpu.memory_space<vmem>>, vector<1x1x8x8xf32>
    %72 = vector.shape_cast %71 : vector<1x1x8x8xf32> to vector<8x8xf32>
    %73 = vector.shape_cast %70 : vector<8x8xf32> to vector<1x1x8x8xf32>
    tpu.vector_store %arg6[%c0_49, %c2_50, %c0_51, %c0_52], %73 {strides = array<i32>} : memref<1x4x8x8xf32, #tpu.memory_space<vmem>>, vector<1x1x8x8xf32>,
    %c3 = arith.constant 3 : index
    %c0_53 = arith.constant 0 : index
    %c0_54 = arith.constant 0 : index
    %74 = vector.load %arg3[%c3, %c0_53, %c0_54] : memref<4x32x8xf32, #tpu.memory_space<vmem>>, vector<1x32x8xf32>
    %75 = vector.shape_cast %74 : vector<1x32x8xf32> to vector<32x8xf32>
    %cst_55 = arith.constant dense<0.000000e+00> : vector<8x8xf32>
    %76 = tpu.matmul %7, %75, %cst_55 {dimension_numbers = #tpu.dot_dimension_numbers<[1], [0], [0], [1], [0, 0, 1, 1], [], []>} : vector<8x32xf32>, vector<32x8xf32>, vector<8x8xf32> -> vector<8x8xf32>
    %c3_56 = arith.constant 3 : index
    %c0_57 = arith.constant 0 : index
    %c0_58 = arith.constant 0 : index
    %77 = vector.load %arg7[%c3_56, %c0_57, %c0_58] : memref<4x16x8xf32, #tpu.memory_space<vmem>>, vector<1x16x8xf32>
    %78 = vector.shape_cast %77 : vector<1x16x8xf32> to vector<16x8xf32>
    %c3_59 = arith.constant 3 : index
    %c0_60 = arith.constant 0 : index
    %c0_61 = arith.constant 0 : index
    %79 = vector.load %arg8[%c3_59, %c0_60, %c0_61] : memref<4x16x8xf32, #tpu.memory_space<vmem>>, vector<1x16x8xf32>
    %80 = vector.shape_cast %79 : vector<1x16x8xf32> to vector<16x8xf32>
    "tpu.trace_start"() <{level = 10 : i32, message = "qd,kd->qk"}> : () -> ()
    %cst_62 = arith.constant dense<0.000000e+00> : vector<8x16xf32>
    %81 = tpu.matmul %76, %78, %cst_62 {dimension_numbers = #tpu.dot_dimension_numbers<[1], [1], [0], [0], [0, 0, 1, 0], [], []>} : vector<8x8xf32>, vector<16x8xf32>, vector<8x16xf32> -> vector<8x16xf32>
    "tpu.trace_stop"() : () -> ()
    %cst_63 = arith.constant dense<0xFF800000> : vector<8xf32>
    %82 = vector.multi_reduction <maximumf>, %81, %cst_63 [1] : vector<8x16xf32> to vector<8xf32>
    %83 = vector.shape_cast %82 : vector<8xf32> to vector<8x1xf32>
    %84 = vector.broadcast %83 : vector<8x1xf32> to vector<8x16xf32>
    %85 = arith.subf %81, %84 : vector<8x16xf32>
    %86 = math.exp %85 : vector<8x16xf32>
    %cst_64 = arith.constant dense<0.000000e+00> : vector<8xf32>
    %87 = vector.multi_reduction <add>, %86, %cst_64 [1] : vector<8x16xf32> to vector<8xf32>
    %88 = vector.shape_cast %87 : vector<8xf32> to vector<8x1xf32>
    %cst_65 = arith.constant dense<0.000000e+00> : vector<8x8xf32>
    %89 = tpu.matmul %86, %80, %cst_65 {dimension_numbers = #tpu.dot_dimension_numbers<[1], [0], [0], [1], [0, 0, 1, 1], [], []>} : vector<8x16xf32>, vector<16x8xf32>, vector<8x8xf32> -> vector<8x8xf32>
    %90 = tpu.reciprocal %88 {approx = true} : vector<8x1xf32> -> vector<8x1xf32>
    %91 = vector.broadcast %90 : vector<8x1xf32> to vector<8x8xf32>
    %92 = arith.mulf %89, %91 : vector<8x8xf32>
    %c0_66 = arith.constant 0 : index
    %c3_67 = arith.constant 3 : index
    %c0_68 = arith.constant 0 : index
    %c0_69 = arith.constant 0 : index
    %93 = vector.load %arg6[%c0_66, %c3_67, %c0_68, %c0_69] : memref<1x4x8x8xf32, #tpu.memory_space<vmem>>, vector<1x1x8x8xf32>
    %94 = vector.shape_cast %93 : vector<1x1x8x8xf32> to vector<8x8xf32>
    %95 = vector.shape_cast %92 : vector<8x8xf32> to vector<1x1x8x8xf32>
    tpu.vector_store %arg6[%c0_66, %c3_67, %c0_68, %c0_69], %95 {strides = array<i32>} : memref<1x4x8x8xf32, #tpu.memory_space<vmem>>, vector<1x1x8x8xf32>,
    return
  }
  func.func @transform_0(%arg0: i32, %arg1: i32) -> (i32, i32, i32) {
    %c0_i32 = arith.constant 0 : i32
    %c0_i32_0 = arith.constant 0 : i32
    %c0_i32_1 = arith.constant 0 : i32
    return %arg0, %c0_i32, %c0_i32_0 : i32, i32, i32
  }
  func.func @transform_1(%arg0: i32, %arg1: i32) -> (i32, i32, i32) {
    %c0_i32 = arith.constant 0 : i32
    %c0_i32_0 = arith.constant 0 : i32
    %c0_i32_1 = arith.constant 0 : i32
    %c0_i32_2 = arith.constant 0 : i32
    return %c0_i32, %c0_i32_0, %c0_i32_1 : i32, i32, i32
  }
  func.func @transform_2(%arg0: i32, %arg1: i32) -> (i32, i32, i32) {
    %c0_i32 = arith.constant 0 : i32
    %c0_i32_0 = arith.constant 0 : i32
    %c0_i32_1 = arith.constant 0 : i32
    %c0_i32_2 = arith.constant 0 : i32
    return %c0_i32, %c0_i32_0, %c0_i32_1 : i32, i32, i32
  }
  func.func @transform_3(%arg0: i32, %arg1: i32) -> (i32, i32, i32) {
    %c0_i32 = arith.constant 0 : i32
    %c0_i32_0 = arith.constant 0 : i32
    %c0_i32_1 = arith.constant 0 : i32
    %c0_i32_2 = arith.constant 0 : i32
    return %c0_i32, %c0_i32_0, %c0_i32_1 : i32, i32, i32
  }
  func.func @transform_4(%arg0: i32, %arg1: i32) -> (i32, i32, i32, i32) {
    %c0_i32 = arith.constant 0 : i32
    %c0_i32_0 = arith.constant 0 : i32
    %c0_i32_1 = arith.constant 0 : i32
    return %arg0, %c0_i32, %arg1, %c0_i32_0 : i32, i32, i32, i32
  }
}

</mosaic_0001>

<bundles_post_ra>
// kernel: tpu_custom_call.1
= control target key start
LH: loop header
LB: loop body
LE: loop exit
PB: predicated region body
PF: predicated region fallthrough
CT: control target
= control target key end

     0   :  { %s2636_s15 = smov 0   ;;  %s2638_s16 = smov 0   ;;  %s3026_s0 = inlined_call_operand.vmem [shape: f32[2,16,32], index: 0, kind: input, shape index: {}]   ;;  %s3027_s1 = inlined_call_operand.vmem [shape: f32[4,32,8], index: 1, kind: input, shape index: {}]   ;;  %s3028_s2 = inlined_call_operand.vmem [shape: f32[4,32,8], index: 2, kind: input, shape index: {}]   ;;  %s3029_s3 = inlined_call_operand.vmem [shape: f32[4,32,8], index: 3, kind: input, shape index: {}]   ;;  %s3030_s4 = inlined_call_operand.vmem [shape: f32[2,4,16,8], index: 4, kind: output, shape index: {}]  }
   0x1   :  { %s2640_s17 = smov 0   ;;  %s2642_s18 = smov 0  }
   0x2   :  { %s2644_s19 = smov 0   ;;  %s2646_s20 = smov 0  }
   0x3   :  { %s2648_s21 = smov 0  }
   0x4 LB: > { %s23_s22 = sadd.s32 1, %s2598_s19  ;;  %s26_s23 = sadd.s32 1, %s2602_s20  ;;  %s2606_s21 = sphi %s2648_s21, %s14_s21   ;;  %s2602_s20 = sphi %s2646_s20, %s3039_s20   ;;  %s2598_s19 = sphi %s2644_s19, %s3038_s19   ;;  %s2594_s18 = sphi %s2642_s18, %s3037_s18   ;;  %s2590_s17 = sphi %s2640_s17, %s3036_s17   ;;  %s2586_s16 = sphi %s2638_s16, %s3035_s16   ;;  %s2582_s15 = sphi %s2636_s15, %s3034_s15  }
   0x5   : > { %p24_p0 = scmp.ge.s32.totalorder %s23_s22, 2  ;;  %s1990_s24 = sadd.s32 4294967295, %s2606_s21  }
   0x6   : > { %p134_p1 = scmp.ne.s32.totalorder %s2586_s16, %s2582_s15  ;;  %p135_p2 = scmp.eq.s32.totalorder %s1990_s24, 3 }
   0x7   : > { %s3041_s22 = smov (%p24_p0, %s23_s22), 0  ;;  %s3043_s23 = smov (!%p24_p0, %s26_s23), %s2602_s20 }
   0x8   : > { %s120_s25 = ssub.s32 %s2598_s19, %s3041_s22  ;;  %p28_p3 = scmp.ge.s32.totalorder %s3043_s23, 2 }
   0x9   : > { %p1994_p4 = scmp.ge.s32.totalorder %s2606_s21, 1  ;;  %p2682_p5 = por %p135_p2, %p134_p1 }
   0xa   : > { %p176_p6 = scmp.lt.s32.totalorder %s2606_s21, 5  ;;  %s3045_s23 = smov (%p28_p3, %s3043_s23), 0 }
   0xb   : > { %s119_s27 = ssub.s32 %s2602_s20, %s3045_s23  ;;  %s124_s29 = sadd.s32 1, %s2586_s16 }
   0xc   : > { %p177_p7 = pnand %p1994_p4, %p176_p6  ;;  %s121_s28 = sor.u32 %s120_s25, %s119_s27 }
   0xd   : > { %p122_p8 = scmp.eq.s32.totalorder %s121_s28, 0  ;;  %s198_s5 = sand.u32 (!%p177_p7), 1, %s2582_s15  }
   0xe   : > { %180 = sbr.rel (%p177_p7) target bundleno = 2221 (0x8ad), region = 36  ;;  %p201_p9 = scmp.lt.s32.totalorder (!%p177_p7), %s2594_s18, 1 }
   0xf   : > { %s2693_s30 = scalar_select %p122_p8, %s2586_s16, %s124_s29  }
  0x10   : > { %s1995_s6 = sshll.u32 (!%p177_p7), %s198_s5, 5  ;;  %p1998_p10 = scmp.ne.s32.totalorder (!%p177_p7), %s2590_s17, 0 }
  0x11   : > { %s2703_s12 = scalar_lea.vmem (!%p177_p7), [#allocation4], %s1995_s6 }
  0x15   : > { %s202_s7 = scalar_select %p201_p9, %s2594_s18, 1 }
  0x16   : > { %209 = sbr.rel (%p1998_p10) target bundleno = 272 (0x110), region = 40  ;;  %v212_v0 = vld [vmem:[%s3028_s2] sm:$0xff] (!%p1998_p10)  ;;  %v213_v1 = vld [vmem:[%s3028_s2 + $0x8] sm:$0xff] (!%p1998_p10)  ;;  %vm216_vm0 = vcmask (!%p1998_p10), 261120   ;;  %v214_v5 = vld [vmem:[%s3028_s2 + $0x10] sm:$0xff] (!%p1998_p10)  ;;  %vm298_vm1 = vcmask (!%p1998_p10), 64512  }
  0x17   : > { %s2080_s8 = sshll.u32 %s202_s7, 4  ;;  %v301_v2 = vld [vmem:[%s3029_s3] sm:$0xff] (!%p1998_p10)  ;;  %v2361_v3 = vpack.c.bf16 (!%p1998_p10), %v213_v1, %v212_v0  ;;  %v302_v4 = vld [vmem:[%s3029_s3 + $0x8] sm:$0xff] (!%p1998_p10)  ;;  %v215_v6 = vld [vmem:[%s3028_s2 + $0x18] sm:$0xff] (!%p1998_p10) }
  0x18   : > { %s2701_s11 = scalar_lea.vmem %s3026_s0, %s2080_s8  ;;  %v2369_v7 = vpack.c.bf16 (!%p1998_p10), %v302_v4, %v301_v2  ;;  %v2365_v8 = vpack.c.bf16 (!%p1998_p10), %v215_v6, %v214_v5  ;;  %v303_v9 = vld [vmem:[%s3029_s3 + $0x10] sm:$0xff] (!%p1998_p10)  ;;  %v304_v10 = vld [vmem:[%s3029_s3 + $0x18] sm:$0xff] (!%p1998_p10)  ;;  %v2003_v13 = vld [vmem:[%s3028_s2 + $0x20] sm:$0xff] (!%p1998_p10) }
  0x19   : > { %v2731_v11 = vld [vmem:[%s2701_s11] sm:$0xff] (!%p1998_p10)  ;;  %2362 = vmatprep.subr.bf16.mxu0 (!%p1998_p10), %v2361_v3  ;;  %v2373_v12 = vpack.c.bf16 (!%p1998_p10), %v304_v10, %v303_v9  ;;  %v2004_v14 = vld [vmem:[%s3028_s2 + $0x28] sm:$0xff] (!%p1998_p10)  ;;  %v2005_v19 = vld [vmem:[%s3028_s2 + $0x30] sm:$0xff] (!%p1998_p10) }
  0x1a   : > { %2181 = vmatprep.mubr.msk.f32.mxu0 (!%p1998_p10), %vm216_vm0, %v2731_v11  ;;  %2370 = vmatprep.subr.bf16.mxu1 (!%p1998_p10), %v2369_v7  ;;  %v2009_v15 = vld [vmem:[%s3029_s3 + $0x20] sm:$0xff] (!%p1998_p10)  ;;  %v2010_v16 = vld [vmem:[%s3029_s3 + $0x28] sm:$0xff] (!%p1998_p10)  ;;  %v2377_v17 = vpack.c.bf16 (!%p1998_p10), %v2004_v14, %v2003_v13  ;;  %v2006_v20 = vld [vmem:[%s3028_s2 + $0x38] sm:$0xff] (!%p1998_p10) }
  0x1b   : > { %2364 = vmatpush3.bf16.msra.mxu0 (!%p1998_p10), %v2361_v3  ;;  %2372 = vmatpush3.bf16.msra.mxu1 (!%p1998_p10), %v2369_v7  ;;  %v2385_v18 = vpack.c.bf16 (!%p1998_p10), %v2010_v16, %v2009_v15  ;;  %v2011_v21 = vld [vmem:[%s3029_s3 + $0x30] sm:$0xff] (!%p1998_p10)  ;;  %v2012_v22 = vld [vmem:[%s3029_s3 + $0x38] sm:$0xff] (!%p1998_p10)  ;;  %v2762_v23 = vld [vmem:[%s2701_s11 + $0x8] sm:$0xff] (!%p1998_p10)  ;;  %v2381_v24 = vpack.c.bf16 (!%p1998_p10), %v2006_v20, %v2005_v19 }
  0x1c   : > { %2366 = vmatprep.subr.bf16.mxu0 (!%p1998_p10), %v2365_v8  ;;  %2374 = vmatprep.subr.bf16.mxu1 (!%p1998_p10), %v2373_v12  ;;  %v2389_v25 = vpack.c.bf16 (!%p1998_p10), %v2012_v22, %v2011_v21  ;;  %v2015_v26 = vld [vmem:[%s3028_s2 + $0x40] sm:$0xff] (!%p1998_p10)  ;;  %v2016_v27 = vld [vmem:[%s3028_s2 + $0x48] sm:$0xff] (!%p1998_p10)  ;;  %v2017_v32 = vld [vmem:[%s3028_s2 + $0x50] sm:$0xff] (!%p1998_p10) }
  0x1d   : > { %2192 = vmatprep.mubr.msk.f32.mxu1 %vm216_vm0, %v2731_v11  ;;  %v2021_v28 = vld [vmem:[%s3029_s3 + $0x40] sm:$0xff]  ;;  %v2022_v29 = vld [vmem:[%s3029_s3 + $0x48] sm:$0xff]  ;;  %v2393_v30 = vpack.c.bf16 %v2016_v27, %v2015_v26  ;;  %v2018_v33 = vld [vmem:[%s3028_s2 + $0x58] sm:$0xff] }
  0x1e   : > { %v2401_v31 = vpack.c.bf16 %v2022_v29, %v2021_v28  ;;  %v2023_v34 = vld [vmem:[%s3029_s3 + $0x50] sm:$0xff]  ;;  %v2024_v35 = vld [vmem:[%s3029_s3 + $0x58] sm:$0xff]  ;;  %v2397_v36 = vpack.c.bf16 %v2018_v33, %v2017_v32  ;;  %v2027_v38 = vld [vmem:[%s3028_s2 + $0x60] sm:$0xff] }
  0x1f   : > { %2368 = vmatpush3.bf16.msra.mxu0 %v2365_v8  ;;  %2376 = vmatpush3.bf16.msra.mxu1 %v2373_v12  ;;  %v2405_v37 = vpack.c.bf16 %v2024_v35, %v2023_v34  ;;  %v2028_v39 = vld [vmem:[%s3028_s2 + $0x68] sm:$0xff]  ;;  %v2033_v40 = vld [vmem:[%s3029_s3 + $0x60] sm:$0xff]  ;;  %v2029_v44 = vld [vmem:[%s3028_s2 + $0x70] sm:$0xff] }
  0x20   : > { %2378 = vmatprep.subr.bf16.mxu0 %v2377_v17  ;;  %2386 = vmatprep.subr.bf16.mxu1 %v2385_v18  ;;  %v2034_v41 = vld [vmem:[%s3029_s3 + $0x68] sm:$0xff]  ;;  %v2409_v42 = vpack.c.bf16 %v2028_v39, %v2027_v38  ;;  %v2030_v45 = vld [vmem:[%s3028_s2 + $0x78] sm:$0xff]  ;;  %v2035_v46 = vld [vmem:[%s3029_s3 + $0x70] sm:$0xff] }
  0x21   : > { %v2417_v43 = vpack.c.bf16 %v2034_v41, %v2033_v40  ;;  %v2036_v47 = vld [vmem:[%s3029_s3 + $0x78] sm:$0xff]  ;;  %v2413_v48 = vpack.c.bf16 %v2030_v45, %v2029_v44 }
  0x22   : > { %2182 = vmatmul.mubr.msk.f32.vlgmr.msra.gmra.mrb[0].mxu0 %vm216_vm0, %v2762_v23  ;;  %2193 = vmatmul.mubr.msk.f32.vlgmr.msra.gmra.mrb[0].mxu1 %vm216_vm0, %v2762_v23  ;;  %v2421_v49 = vpack.c.bf16 %v2036_v47, %v2035_v46 }
  0x23   : > { %2380 = vmatpush3.bf16.msra.mxu0 %v2377_v17  ;;  %2388 = vmatpush3.bf16.msra.mxu1 %v2385_v18 }
  0x24   : > { %2382 = vmatprep.subr.bf16.mxu0 %v2381_v24  ;;  %2390 = vmatprep.subr.bf16.mxu1 %v2389_v25 }
  0x25   : > { %2203 = vmatprep.mubr.msk.f32.mxu0 %vm216_vm0, %v2731_v11  ;;  %2214 = vmatprep.mubr.msk.f32.mxu1 %vm216_vm0, %v2731_v11 }
  0x27   : > { %2384 = vmatpush3.bf16.msra.mxu0 %v2381_v24  ;;  %2392 = vmatpush3.bf16.msra.mxu1 %v2389_v25 }
  0x28   : > { %2394 = vmatprep.subr.bf16.mxu0 %v2393_v30  ;;  %2402 = vmatprep.subr.bf16.mxu1 %v2401_v31 }
  0x2a   : > { %2204 = vmatmul.mubr.msk.f32.vlgmr.msra.gmra.mrb[2].mxu0 %vm216_vm0, %v2762_v23  ;;  %2215 = vmatmul.mubr.msk.f32.vlgmr.msra.gmra.mrb[2].mxu1 %vm216_vm0, %v2762_v23 }
  0x2b   : > { %2396 = vmatpush3.bf16.msra.mxu0 %v2393_v30  ;;  %2404 = vmatpush3.bf16.msra.mxu1 %v2401_v31 }
  0x2c   : > { %2398 = vmatprep.subr.bf16.mxu0 %v2397_v36  ;;  %2406 = vmatprep.subr.bf16.mxu1 %v2405_v37 }
  0x2d   : > { %2225 = vmatprep.mubr.msk.f32.mxu0 %vm216_vm0, %v2731_v11  ;;  %2236 = vmatprep.mubr.msk.f32.mxu1 %vm216_vm0, %v2731_v11 }
  0x2f   : > { %2400 = vmatpush3.bf16.msra.mxu0 %v2397_v36  ;;  %2408 = vmatpush3.bf16.msra.mxu1 %v2405_v37 }
  0x30   : > { %2410 = vmatprep.subr.bf16.mxu0 %v2409_v42  ;;  %2418 = vmatprep.subr.bf16.mxu1 %v2417_v43 }
  0x32   : > { %2226 = vmatmul.mubr.msk.f32.vlgmr.msra.gmra.mrb[4].mxu0 %vm216_vm0, %v2762_v23  ;;  %2237 = vmatmul.mubr.msk.f32.vlgmr.msra.gmra.mrb[4].mxu1 %vm216_vm0, %v2762_v23 }
  0x33   : > { %2412 = vmatpush3.bf16.msra.mxu0 %v2409_v42  ;;  %2420 = vmatpush3.bf16.msra.mxu1 %v2417_v43 }
  0x34   : > { %2414 = vmatprep.subr.bf16.mxu0 %v2413_v48  ;;  %2422 = vmatprep.subr.bf16.mxu1 %v2421_v49 }
  0x35   : > { %2247 = vmatprep.mubr.msk.f32.mxu0 %vm216_vm0, %v2731_v11  ;;  %2258 = vmatprep.mubr.msk.f32.mxu1 %vm216_vm0, %v2731_v11 }
  0x37   : > { %2416 = vmatpush3.bf16.msra.mxu0 %v2413_v48  ;;  %2424 = vmatpush3.bf16.msra.mxu1 %v2421_v49 }
  0x3a   : > { %2248 = vmatmul.mubr.msk.f32.vlgmr.msra.gmra.mrb[6].mxu0 %vm216_vm0, %v2762_v23  ;;  %2259 = vmatmul.mubr.msk.f32.vlgmr.msra.gmra.mrb[6].mxu1 %vm216_vm0, %v2762_v23 }
  0xf5   : > { %v2183_v50 = vpop.f32.mrb[0].mxu0  ;;  %v2194_v51 = vpop.f32.mrb[0].mxu1 }
  0xf6   : > { %300 = vst.msk [vmem:[#allocation2 + $0x8] sm:$0xff] %vm298_vm1, %v2183_v50  ;;  %v289_v52 = vpop.f32.mrb[1].mxu0  ;;  %381 = vst.msk [vmem:[#allocation3 + $0x8] sm:$0xff] %vm298_vm1, %v2194_v51  ;;  %v371_v53 = vpop.f32.mrb[1].mxu1 }
  0xf7   : > { %299 = vst.msk [vmem:[#allocation2] sm:$0xff] %vm298_vm1, %v289_v52  ;;  %380 = vst.msk [vmem:[#allocation3] sm:$0xff] %vm298_vm1, %v371_v53 }
  0xfd   : > { %v2205_v54 = vpop.f32.mrb[2].mxu0  ;;  %v2216_v55 = vpop.f32.mrb[2].mxu1 }
  0xfe   : > { %464 = vst.msk [vmem:[#allocation2 + $0x18] sm:$0xff] %vm298_vm1, %v2205_v54  ;;  %v453_v56 = vpop.f32.mrb[3].mxu0  ;;  %547 = vst.msk [vmem:[#allocation3 + $0x18] sm:$0xff] %vm298_vm1, %v2216_v55  ;;  %v536_v57 = vpop.f32.mrb[3].mxu1 }
  0xff   : > { %463 = vst.msk [vmem:[#allocation2 + $0x10] sm:$0xff] %vm298_vm1, %v453_v56  ;;  %546 = vst.msk [vmem:[#allocation3 + $0x10] sm:$0xff] %vm298_vm1, %v536_v57 }
 0x105   : > { %v2227_v58 = vpop.f32.mrb[4].mxu0  ;;  %v2238_v59 = vpop.f32.mrb[4].mxu1 }
 0x106   : > { %630 = vst.msk [vmem:[#allocation2 + $0x28] sm:$0xff] %vm298_vm1, %v2227_v58  ;;  %v619_v60 = vpop.f32.mrb[5].mxu0  ;;  %713 = vst.msk [vmem:[#allocation3 + $0x28] sm:$0xff] %vm298_vm1, %v2238_v59  ;;  %v702_v61 = vpop.f32.mrb[5].mxu1 }
 0x107   : > { %629 = vst.msk [vmem:[#allocation2 + $0x20] sm:$0xff] %vm298_vm1, %v619_v60  ;;  %712 = vst.msk [vmem:[#allocation3 + $0x20] sm:$0xff] %vm298_vm1, %v702_v61 }
 0x10d   : > { %v2249_v62 = vpop.f32.mrb[6].mxu0  ;;  %v2260_v63 = vpop.f32.mrb[6].mxu1 }
 0x10e   : > { %796 = vst.msk [vmem:[#allocation2 + $0x38] sm:$0xff] %vm298_vm1, %v2249_v62  ;;  %v785_v0 = vpop.f32.mrb[7].mxu0  ;;  %879 = vst.msk [vmem:[#allocation3 + $0x38] sm:$0xff] %vm298_vm1, %v2260_v63  ;;  %v868_v1 = vpop.f32.mrb[7].mxu1 }
 0x10f   : > { %795 = vst.msk [vmem:[#allocation2 + $0x30] sm:$0xff] %vm298_vm1, %v785_v0  ;;  %878 = vst.msk [vmem:[#allocation3 + $0x30] sm:$0xff] %vm298_vm1, %v868_v1 }
 0x110 PF: > { %v883_v2 = vld [vmem:[%s3027_s1] sm:$0xff]  ;;  %v884_v3 = vld [vmem:[%s3027_s1 + $0x8] sm:$0xff]  ;;  %v885_v4 = vld [vmem:[%s3027_s1 + $0x10] sm:$0xff]  ;;  %v2608_v5 = vmov 0.0|0.0   ;;  %vm2609_vm2 = vmmov 0   ;;  %v2610_v8 = vmov 0.0  }
 0x111   : > { %2425 = vmatprep.subr.bf16.mxu0 %v2608_v5  ;;  %v2426_v6 = vpack.c.bf16 %v884_v3, %v883_v2  ;;  %v886_v7 = vld [vmem:[%s3027_s1 + $0x18] sm:$0xff]  ;;  %2269 = vmatprep.mubr.msk.f32.mxu0 %vm2609_vm2, %v2610_v8  ;;  %s2039_s15 = sshll.u32 %s2590_s17, 3  ;;  %v961_v9 = vld [vmem:[#allocation2] sm:$0xff]  ;;  %v962_v10 = vld [vmem:[#allocation2 + $0x8] sm:$0xff]  ;;  %vm965_vm3 = vcmask 64512   ;;  %vm887_vm5 = vcmask 261120  }
 0x112   : > { %2431 = vmatprep.subr.bf16.mxu1 %v2608_v5  ;;  %v2432_v11 = vpack.c.bf16 %v962_v10, %v961_v9  ;;  %vm2875_vm4 = vmpackc.low %vm965_vm3, %vm965_vm3  ;;  %2276 = vmatprep.mubr.msk.f32.mxu1 %vm2609_vm2, %v2610_v8  ;;  %v2429_v13 = vpack.c.bf16 %v886_v7, %v885_v4  ;;  %s881_s24 = scalar_lea.vmem %s2701_s11, %s2039_s15  ;;  %v2045_v15 = vld [vmem:[%s3027_s1 + $0x20] sm:$0xff]  ;;  %v2046_v16 = vld [vmem:[%s3027_s1 + $0x28] sm:$0xff]  ;;  %vm1045_vm6 = vcmask 130048   ;;  %s2076_s9 = sshll.u32 (%p2682_p5), %s2594_s18, 3 }
 0x113   : > { %2427 = vmatpush3.bf16.msra.mxu0 %v2426_v6  ;;  %v2886_v14 = vld [vmem:[%s881_s24] sm:$0xff]  ;;  %v2439_v17 = vpack.c.bf16 %v2046_v16, %v2045_v15  ;;  %v2047_v18 = vld [vmem:[%s3027_s1 + $0x30] sm:$0xff]  ;;  %v2048_v19 = vld [vmem:[%s3027_s1 + $0x38] sm:$0xff]  ;;  %s1877_s10 = sadd.s32 (%p2682_p5), %s2590_s17, %s2076_s9 }
 0x114   : > { %2428 = vmatprep.subr.bf16.mxu0 %v2608_v5  ;;  %2434 = vmatpush3.bf16.xpose.msk.msra.mxu1 %vm2875_vm4, %v2432_v11  ;;  %v2442_v22 = vpack.c.bf16 %v2048_v19, %v2047_v18  ;;  %v963_v26 = vld [vmem:[#allocation3] sm:$0xff]  ;;  %v964_v27 = vld [vmem:[#allocation3 + $0x8] sm:$0xff]  ;;  %v1207_v34 = vld [vmem:[#allocation2 + $0x10] sm:$0xff]  ;;  %s2077_s13 = sshll.u32 (%p2682_p5), %s1877_s10, 3 }
 0x115   : > { %2438 = vmatprep.subr.bf16.mxu1 %v2608_v5  ;;  %v2436_v28 = vpack.c.bf16 %v964_v27, %v963_v26  ;;  %v1208_v35 = vld [vmem:[#allocation2 + $0x18] sm:$0xff]  ;;  %v2055_v38 = vld [vmem:[%s3027_s1 + $0x40] sm:$0xff]  ;;  %v2056_v39 = vld [vmem:[%s3027_s1 + $0x48] sm:$0xff]  ;;  %s1879_s24 = scalar_lea.vmem (%p2682_p5), %s3030_s4, %s2077_s13 }
 0x116   : > { %v2445_v36 = vpack.c.bf16 %v1208_v35, %v1207_v34  ;;  %v2452_v40 = vpack.c.bf16 %v2056_v39, %v2055_v38  ;;  %v2057_v41 = vld [vmem:[%s3027_s1 + $0x50] sm:$0xff]  ;;  %v2058_v42 = vld [vmem:[%s3027_s1 + $0x58] sm:$0xff]  ;;  %v1453_v59 = vld [vmem:[#allocation2 + $0x20] sm:$0xff] }
 0x117   : > { %2430 = vmatpush3.bf16.msra.mxu0 %v2429_v13  ;;  %v2455_v43 = vpack.c.bf16 %v2058_v42, %v2057_v41  ;;  %v1210_v50 = vld [vmem:[#allocation3 + $0x10] sm:$0xff]  ;;  %v1211_v51 = vld [vmem:[#allocation3 + $0x18] sm:$0xff]  ;;  %v1454_v60 = vld [vmem:[#allocation2 + $0x28] sm:$0xff] }
 0x118   : > { %2435 = vmatprep.subr.bf16.mxu0 %v2608_v5  ;;  %v2449_v52 = vpack.c.bf16 %v1211_v51, %v1210_v50  ;;  %v2458_v61 = vpack.c.bf16 %v1454_v60, %v1453_v59  ;;  %v2065_v1 = vld [vmem:[%s3027_s1 + $0x60] sm:$0xff]  ;;  %v2066_v2 = vld [vmem:[%s3027_s1 + $0x68] sm:$0xff]  ;;  %v2067_v4 = vld [vmem:[%s3027_s1 + $0x70] sm:$0xff] }
 0x119   : > { %v2465_v3 = vpack.c.bf16 %v2066_v2, %v2065_v1  ;;  %v2068_v6 = vld [vmem:[%s3027_s1 + $0x78] sm:$0xff]  ;;  %v1456_v16 = vld [vmem:[#allocation3 + $0x20] sm:$0xff]  ;;  %v1702_v35 = vld [vmem:[#allocation3 + $0x30] sm:$0xff] }
 0x11a   : > { %2270 = vmatmul.mubr.msk.f32.vlgmr.msra.gmra.mrb[0].mxu0 %vm887_vm5, %v2886_v14  ;;  %v2468_v7 = vpack.c.bf16 %v2068_v6, %v2067_v4 }
 0x11b   : > { %2283 = vmatprep.mubr.msk.f32.mxu0 %vm2609_vm2, %v2610_v8  ;;  %2437 = vmatpush3.bf16.msra.mxu0 %v2436_v28 }
 0x11c   : > { %2444 = vmatprep.subr.bf16.mxu0 %v2608_v5 }
 0x1ed   : > { %v957_v20 = vpop.f32.mrb[0].mxu0 }
 0x1ee   : > { %v2271_v21 = vpop.f32.mrb[1].mxu0  ;;  %2277 = vmatmul.mubr.msk.f32.vlgmr.msra.gmra.mrb[0].mxu1 %vm965_vm3, %v957_v20 }
 0x1ef   : > { %2440 = vmatpush3.bf16.msra.mxu1 %v2439_v17  ;;  %2294 = vmatprep.mubr.msk.f32.mxu1 %vm2609_vm2, %v2610_v8  ;;  %v1457_v17 = vld [vmem:[#allocation3 + $0x28] sm:$0xff] }
 0x1f0   : > { %2441 = vmatprep.subr.bf16.mxu1 %v2608_v5  ;;  %v2462_v18 = vpack.c.bf16 %v1457_v17, %v1456_v16 }
 0x1f3   : > { %2443 = vmatpush3.bf16.msra.mxu1 %v2442_v22 }
 0x1f4   : > { %2448 = vmatprep.subr.bf16.mxu1 %v2608_v5 }
 0x1f6   : > { %2295 = vmatmul.mubr.msk.f32.vlgmr.msra.gmra.mrb[2].mxu1 %vm887_vm5, %v2886_v14 }
 0x1f7   : > { %2308 = vmatprep.mubr.msk.f32.mxu1 %vm2609_vm2, %v2610_v8  ;;  %2450 = vmatpush3.bf16.msra.mxu1 %v2449_v52 }
 0x1f8   : > { %2457 = vmatprep.subr.bf16.mxu1 %v2608_v5 }
 0x2c1   : > { %v1041_v23 = vpop.f32.mrb[0].mxu1 }
 0x2c2   : > { %v2278_v24 = vpop.f32.mrb[1].mxu1  ;;  %v1046_v25 = vsel %vm1045_vm6, %v1041_v23, -inf }
 0x2c3   : > { %1047 = vmax.xlane.f32.xlu0 %v1046_v25  ;;  %v1700_v24 = vld [vmem:[#allocation2 + $0x38] sm:$0xff] }
 0x2c9   : > { %v1202_v29 = vpop.f32.mrb[2].mxu1 }
 0x2ca   : > { %v2296_v30 = vpop.f32.mrb[3].mxu1 }
 0x350   : > { %v1048_v31 = vpop.xlane.xlu0 %1047 }
 0x351   : > { %v1049_v32 = vsub.f32 %v1041_v23, %v1048_v31  ;;  %v1699_v23 = vld [vmem:[#allocation2 + $0x30] sm:$0xff] }
 0x352   : > { %v2471_v25 = vpack.c.bf16 %v1700_v24, %v1699_v23 }
 0x353   : > { %v1050_v33 = vmul.f32 1.442695, %v1049_v32 }
 0x355   : > { %2536 = vpow2.f32 %v1050_v33 }
 0x35f   : > { %v2537_v37 = vpop.eup %2536 }
 0x360   : > { %2284 = vmatmul.mubr.msk.f32.vlgmr.msra.gmra.mrb[2].mxu0 %vm1045_vm6, %v2537_v37  ;;  %v1052_v49 = vsel %vm1045_vm6, %v2537_v37, 0.0 }
 0x361   : > { %2447 = vmatpush3.bf16.xpose.msk.msra.mxu0 %vm2875_vm4, %v2445_v36  ;;  %2301 = vmatprep.mubr.msk.f32.mxu0 %vm2609_vm2, %v2610_v8 }
 0x362   : > { %2451 = vmatprep.subr.bf16.mxu0 %v2608_v5 }
 0x368   : > { %2302 = vmatmul.mubr.msk.f32.vlgmr.msra.gmra.mrb[4].mxu0 %vm965_vm3, %v1202_v29 }
 0x369   : > { %2453 = vmatpush3.bf16.msra.mxu0 %v2452_v40  ;;  %2319 = vmatprep.mubr.msk.f32.mxu0 %vm2609_vm2, %v2610_v8 }
 0x36a   : > { %2454 = vmatprep.subr.bf16.mxu0 %v2608_v5 }
 0x36d   : > { %2456 = vmatpush3.bf16.msra.mxu0 %v2455_v43 }
 0x36e   : > { %2461 = vmatprep.subr.bf16.mxu0 %v2608_v5 }
 0x370   : > { %2320 = vmatmul.mubr.msk.f32.vlgmr.msra.gmra.mrb[6].mxu0 %vm887_vm5, %v2886_v14 }
 0x371   : > { %2333 = vmatprep.mubr.msk.f32.mxu0 %vm2609_vm2, %v2610_v8  ;;  %2463 = vmatpush3.bf16.msra.mxu0 %v2462_v18 }
 0x372   : > { %2470 = vmatprep.subr.bf16.mxu0 %v2608_v5 }
 0x433   : > { %v1124_v44 = vpop.f32.mrb[2].mxu0 }
 0x434   : > { %v2285_v45 = vpop.f32.mrb[3].mxu0 }
 0x43b   : > { %v1287_v46 = vpop.f32.mrb[4].mxu0 }
 0x43c   : > { %v2303_v47 = vpop.f32.mrb[5].mxu0  ;;  %v1291_v48 = vsel %vm1045_vm6, %v1287_v46, -inf }
 0x43d   : > { %1292 = vmax.xlane.f32.xlu0 %v1291_v48 }
 0x441   : > { %1053 = vadd.xlane.f32.xlu0 %v1052_v49 }
 0x443   : > { %v1448_v53 = vpop.f32.mrb[6].mxu0 }
 0x444   : > { %v2321_v54 = vpop.f32.mrb[7].mxu0 }
 0x4ca   : > { %v1293_v55 = vpop.xlane.xlu0 %1292 }
 0x4cb   : > { %v1294_v56 = vsub.f32 %v1287_v46, %v1293_v55 }
 0x4cd   : > { %v1295_v57 = vmul.f32 1.442695, %v1294_v56 }
 0x4ce   : > { %v1054_v58 = vpop.xlane.xlu0 %1053 }
 0x4cf   : > { %2538 = vpow2.f32 %v1295_v57 }
 0x4d0   : > { %2540 = vrcp.f32 %v1054_v58 }
 0x4d9   : > { %v2539_v62 = vpop.eup %2538 }
 0x4da   : > { %v2541_v63 = vpop.eup %2540  ;;  %2309 = vmatmul.mubr.msk.f32.vlgmr.msra.gmra.mrb[4].mxu1 %vm1045_vm6, %v2539_v62  ;;  %v1297_v12 = vsel %vm1045_vm6, %v2539_v62, 0.0 }
 0x4db   : > { %v1129_v0 = vmul.f32 %v2541_v63, %v1124_v44  ;;  %2460 = vmatpush3.bf16.xpose.msk.msra.mxu1 %vm2875_vm4, %v2458_v61  ;;  %2326 = vmatprep.mubr.msk.f32.mxu1 %vm2609_vm2, %v2610_v8 }
 0x4dc   : > { %2464 = vmatprep.subr.bf16.mxu1 %v2608_v5 }
 0x4dd   : > { %1130 = vst.msk [vmem:[%s2703_s12] sm:$0xff] %vm965_vm3, %v1129_v0 }
 0x4e2   : > { %2327 = vmatmul.mubr.msk.f32.vlgmr.msra.gmra.mrb[6].mxu1 %vm965_vm3, %v1448_v53 }
 0x4e3   : > { %2466 = vmatpush3.bf16.msra.mxu1 %v2465_v3  ;;  %2344 = vmatprep.mubr.msk.f32.mxu1 %vm2609_vm2, %v2610_v8 }
 0x4e4   : > { %2467 = vmatprep.subr.bf16.mxu1 %v2608_v5  ;;  %v1913_v50 = vld [vmem:[%s2703_s12] sm:$0xff] (%p2682_p5) }
 0x4e5   : > { %1914 = vst [vmem:[%s1879_s24] sm:$0xff] (%p2682_p5), %v1913_v50 }
 0x4e7   : > { %2469 = vmatpush3.bf16.msra.mxu1 %v2468_v7 }
 0x4e8   : > { %2474 = vmatprep.subr.bf16.mxu1 %v2608_v5 }
 0x4ea   : > { %2345 = vmatmul.mubr.msk.f32.vlgmr.msra.gmra.mrb[8].mxu1 %vm887_vm5, %v2886_v14 }
 0x4eb   : > { %2358 = vmatprep.mubr.msk.f32.mxu1 %vm2609_vm2, %v2610_v8 }
 0x5ad   : > { %v1369_v9 = vpop.f32.mrb[4].mxu1 }
 0x5ae   : > { %v2310_v10 = vpop.f32.mrb[5].mxu1 }
 0x5b5   : > { %v1533_v11 = vpop.f32.mrb[6].mxu1 }
 0x5b6   : > { %v2328_v13 = vpop.f32.mrb[7].mxu1  ;;  %v1537_v15 = vsel %vm1045_vm6, %v1533_v11, -inf }
 0x5b7   : > { %1538 = vmax.xlane.f32.xlu1 %v1537_v15 }
 0x5bd   : > { %v1694_v19 = vpop.f32.mrb[8].mxu1 }
 0x5be   : > { %v2346_v20 = vpop.f32.mrb[9].mxu1 }
 0x644   : > { %v1539_v21 = vpop.xlane.xlu1 %1538 }
 0x645   : > { %v1540_v14 = vsub.f32 %v1533_v11, %v1539_v21 }
 0x647   : > { %v1541_v22 = vmul.f32 1.442695, %v1540_v14 }
 0x649   : > { %2542 = vpow2.f32 %v1541_v22 }
 0x653   : > { %v2543_v26 = vpop.eup %2542 }
 0x654   : > { %2334 = vmatmul.mubr.msk.f32.vlgmr.msra.gmra.mrb[8].mxu0 %vm1045_vm6, %v2543_v26  ;;  %v1543_v27 = vsel %vm1045_vm6, %v2543_v26, 0.0 }
 0x655   : > { %2473 = vmatpush3.bf16.xpose.msk.msra.mxu0 %vm2875_vm4, %v2471_v25  ;;  %1544 = vadd.xlane.f32.xlu0 %v1543_v27 }
 0x656   : > { %2351 = vmatprep.mubr.msk.f32.mxu0 %vm2609_vm2, %v2610_v8  ;;  %v1703_v8 = vld [vmem:[#allocation3 + $0x38] sm:$0xff] }
 0x657   : > { %v2475_v36 = vpack.c.bf16 %v1703_v8, %v1702_v35 }
 0x659   : > { %2476 = vmatpush3.bf16.msra.mxu1 %v2475_v36 }
 0x65c   : > { %2352 = vmatmul.mubr.msk.f32.vlgmr.msra.gmra.mrb[10].mxu0 %vm965_vm3, %v1694_v19 }
 0x6e2   : > { %v1545_v5 = vpop.xlane.xlu0 %1544 }
 0x6e3   : > { %2544 = vrcp.f32 %v1545_v5 }
 0x6ed   : > { %v2545_v28 = vpop.eup %2544 }
 0x727   : > { %v1615_v29 = vpop.f32.mrb[8].mxu0 }
 0x728   : > { %v1620_v30 = vmul.f32 %v2545_v28, %v1615_v29  ;;  %v2335_v31 = vpop.f32.mrb[9].mxu0 }
 0x72a   : > { %2064 = vst.msk [vmem:[%s2703_s12 + $0x10] sm:$0xff] %vm965_vm3, %v1620_v30 }
 0x72f   : > { %v1779_v32 = vpop.f32.mrb[10].mxu0 }
 0x730   : > { %v2353_v33 = vpop.f32.mrb[11].mxu0  ;;  %v1783_v34 = vsel %vm1045_vm6, %v1779_v32, -inf }
 0x731   : > { %1784 = vmax.xlane.f32.xlu1 %v1783_v34  ;;  %v1917_v52 = vld [vmem:[%s2703_s12 + $0x10] sm:$0xff] (%p2682_p5) }
 0x732   : > { %1918 = vst [vmem:[%s1879_s24 + $0x20] sm:$0xff] (%p2682_p5), %v1917_v52 }
 0x735   : > { %1298 = vadd.xlane.f32.xlu1 %v1297_v12 }
 0x7be   : > { %v1785_v37 = vpop.xlane.xlu1 %1784 }
 0x7bf   : > { %v1786_v38 = vsub.f32 %v1779_v32, %v1785_v37 }
 0x7c1   : > { %v1787_v39 = vmul.f32 1.442695, %v1786_v38 }
 0x7c2   : > { %v1299_v40 = vpop.xlane.xlu1 %1298 }
 0x7c3   : > { %2546 = vpow2.f32 %v1787_v39 }
 0x7c4   : > { %2548 = vrcp.f32 %v1299_v40 }
 0x7cd   : > { %v2547_v41 = vpop.eup %2546 }
 0x7ce   : > { %v2549_v42 = vpop.eup %2548  ;;  %2359 = vmatmul.mubr.msk.f32.vlgmr.msra.gmra.mrb[10].mxu1 %vm1045_vm6, %v2547_v41  ;;  %v1789_v43 = vsel %vm1045_vm6, %v2547_v41, 0.0 }
 0x7cf   : > { %v1374_v44 = vmul.f32 %v2549_v42, %v1369_v9  ;;  %1790 = vadd.xlane.f32.xlu1 %v1789_v43 }
 0x7d1   : > { %2054 = vst.msk [vmem:[%s2703_s12 + $0x8] sm:$0xff] %vm965_vm3, %v1374_v44 }
 0x7d8   : > { %v1915_v51 = vld [vmem:[%s2703_s12 + $0x8] sm:$0xff] (%p2682_p5) }
 0x7d9   : > { %1916 = vst [vmem:[%s1879_s24 + $0x10] sm:$0xff] (%p2682_p5), %v1915_v51 }
 0x85c   : > { %v1791_v45 = vpop.xlane.xlu1 %1790 }
 0x85d   : > { %2550 = vrcp.f32 %v1791_v45 }
 0x867   : > { %v2551_v46 = vpop.eup %2550 }
 0x89e   : > { %1875 = sbr.rel (!%p2682_p5) target bundleno = 2221 (0x8ad), region = 44 }
 0x8a1   : > { %v1861_v47 = vpop.f32.mrb[10].mxu1 }
 0x8a2   : > { %v1866_v48 = vmul.f32 %v2551_v46, %v1861_v47  ;;  %v2360_v49 = vpop.f32.mrb[11].mxu1 }
 0x8a4   : > { %2074 = vst.msk [vmem:[%s2703_s12 + $0x18] sm:$0xff] %vm965_vm3, %v1866_v48 }
 0x8ab   : > { %v1919_v53 = vld [vmem:[%s2703_s12 + $0x18] sm:$0xff] }
 0x8ac   : > { %1920 = vst [vmem:[%s1879_s24 + $0x30] sm:$0xff] %v1919_v53 }
 0x8ad PF: > { %s14_s21 = sadd.s32 1, %s2606_s21   ;;  %s3034_s15 = smov %s2586_s16 }
 0x8ae   : > { %p11_p11 = scmp.ge.s32.totalorder %s14_s21, 6   ;;  %s3035_s16 = smov %s2693_s30 }
 0x8af   : > { %s3036_s17 = smov %s2598_s19  ;;  %s3037_s18 = smov %s2602_s20 }
 0x8b0   : > { %s3038_s19 = smov %s3041_s22  ;;  %s3039_s20 = smov %s3045_s23 }
 0x8b1   :  { %13 = sbr.rel (!%p11_p11) target bundleno = 4 (0x4), region = 133 }

</bundles_post_ra>
